<compile_context>
chip_gen: v7x
topology: tpu7x:2x2x1
jax: 0.10.0
libtpu: 0.0.40
codegen_flags: <defaults>
</compile_context>

<pallas_src>
import math

import numpy as np

import jax
import jax.numpy as jnp
from jax.experimental import pallas as pl
from jax.experimental.pallas import tpu as pltpu

FREQ_EMB_SIZE = 256          # frequency_embedding_size (module default)
HIDDEN_SIZE = 32             # hidden_size (small, per instructions)
MAX_PERIOD = 10000.0


def _round_up(x: int, m: int) -> int:
    return ((x + m - 1) // m) * m


def _host_freqs(half: int) -> np.ndarray:
    """Sinusoid frequency table, computed once on the host (trace time)."""
    return np.exp(
        -(math.log(MAX_PERIOD) / half) * np.arange(half, dtype=np.float32)
    ).astype(np.float32)


def timestep_embedding_kernel(t_ref, freqs_ref, w1c_ref, w1s_ref, w2_ref, o_ref):
    # t_ref    : (R, G)  f32   -- G consecutive timesteps packed per row
    # freqs_ref: (1, half) f32
    # w1c_ref / w1s_ref : (G*half, G*H) bf16  (block-diagonal: kron(I_G, w1_half))
    # w2_ref   : (G*H, G*H) bf16              (block-diagonal: kron(I_G, w2))
    # o_ref    : (R, G*H) f32  -- lane-dense packed output (G*H == 128 when G > 1)
    g = t_ref.shape[1]
    freqs = freqs_ref[...]                                   # (1, half)

    # args[:, j*half:(j+1)*half] = t[:, j:j+1] * freqs ; each piece is 128-lane wide
    # so the concat is vreg-aligned.  Stays f32 (phase precision for large t).
    pieces = [t_ref[:, j:j + 1] * freqs for j in range(g)]
    args = pieces[0] if g == 1 else jnp.concatenate(pieces, axis=-1)  # (R, G*half)

    cos_e = jnp.cos(args).astype(w1c_ref.dtype)              # bf16 MXU inputs
    sin_e = jnp.sin(args).astype(w1s_ref.dtype)

    # emb @ w1 for all G packed timesteps at once via the block-diagonal weights
    # (two MXU passes, f32 accumulation, no (R, 2*G*half) concat buffer).
    h = jnp.dot(cos_e, w1c_ref[...], preferred_element_type=jnp.float32)
    h += jnp.dot(sin_e, w1s_ref[...], preferred_element_type=jnp.float32)

    h = h * jax.nn.sigmoid(h)                                # SiLU, f32, packed vregs

    out = jnp.dot(h.astype(w2_ref.dtype), w2_ref[...],
                  preferred_element_type=jnp.float32)        # (R, G*H)
    o_ref[...] = out.astype(o_ref.dtype)                     # unmasked 128-lane store


def timestep_embedding(t, w1, w2, *, tile_n: int = 4096):
    """t: (N,) timesteps; w1: (FREQ, H); w2: (H, H). Returns (N, H) f32.

    Weights use (in_features, out_features) layout, i.e. the transpose of the
    PyTorch nn.Linear .weight, so the kernel computes x @ w directly.
    """
    n = t.shape[0]
    freq, hidden = w1.shape
    assert freq % 2 == 0, "frequency_embedding_size must be even"
    half = freq // 2

    # Lane-packing factor: G consecutive timesteps per 128-lane output row.
    if hidden <= 128 and 128 % hidden == 0:
        g = 128 // hidden
    else:
        g = 1   # fallback: plain (tile, hidden) output (masked stores)

    align = 8 * g   # keeps every block's sublane dim a multiple of 8
    tile = _round_up(min(tile_n, _round_up(max(n, 1), align)), align)
    # Keep >= 2 grid steps for mid/large N so v7x's two TensorCores both get work
    # (the "parallel" axis shards across them); no cost on single-TC v5e/v6e.
    if n > 1024:
        tile = min(tile, _round_up((n + 1) // 2, align))
    padded_n = _round_up(n, tile)

    t_f = t.astype(jnp.float32)
    if padded_n != n:
        t_f = jnp.pad(t_f, (0, padded_n - n))
    t_g = t_f.reshape(padded_n // g, g)                       # free, row-major view

    freqs = jnp.asarray(_host_freqs(half)).reshape(1, half)

    # Block-diagonal bf16 weights (tiny: <=160 KiB each), VMEM-resident.
    eye = jnp.eye(g, dtype=jnp.float32)
    w1c_big = jnp.kron(eye, w1[:half].astype(jnp.float32)).astype(jnp.bfloat16)
    w1s_big = jnp.kron(eye, w1[half:].astype(jnp.float32)).astype(jnp.bfloat16)
    w2_big = jnp.kron(eye, w2.astype(jnp.float32)).astype(jnp.bfloat16)

    rows = tile // g
    out_dense = pl.pallas_call(
        timestep_embedding_kernel,
        out_shape=jax.ShapeDtypeStruct((padded_n // g, g * hidden), jnp.float32),
        grid=(padded_n // tile,),
        in_specs=[
            pl.BlockSpec((rows, g), lambda i: (i, 0)),                    # t: streamed
            pl.BlockSpec((1, half), lambda i: (0, 0)),                    # freqs: resident
            pl.BlockSpec((g * half, g * hidden), lambda i: (0, 0)),       # w1 cos: resident
            pl.BlockSpec((g * half, g * hidden), lambda i: (0, 0)),       # w1 sin: resident
            pl.BlockSpec((g * hidden, g * hidden), lambda i: (0, 0)),     # w2: resident
        ],
        out_specs=pl.BlockSpec((rows, g * hidden), lambda i: (i, 0)),
        compiler_params=pltpu.CompilerParams(
            dimension_semantics=("parallel",),
        ),
    )(t_g, freqs, w1c_big, w1s_big, w2_big)

    # Row-major contiguous view back to (N, H); cheap slice drops the pad rows.
    return out_dense.reshape(padded_n, hidden)[:n]


def _reference_f32(t, w1, w2):
    """Pure-JAX f32 reference mirroring the PyTorch forward."""
    half = w1.shape[0] // 2
    freqs = jnp.exp(-math.log(MAX_PERIOD) * jnp.arange(half, dtype=jnp.float32) / half)
    args = t[:, None].astype(jnp.float32) * freqs[None]
    emb = jnp.concatenate([jnp.cos(args), jnp.sin(args)], axis=-1)
    h = emb @ w1
    h = h * jax.nn.sigmoid(h)
    return h @ w2


def _reference_bf16(t, w1, w2):
    """Reference mirroring the kernel's bf16 matmul inputs / f32 accumulation."""
    half = w1.shape[0] // 2
    freqs = jnp.asarray(_host_freqs(half))
    args = t[:, None].astype(jnp.float32) * freqs[None]
    cos_e = jnp.cos(args).astype(jnp.bfloat16)
    sin_e = jnp.sin(args).astype(jnp.bfloat16)
    w1b = w1.astype(jnp.bfloat16)
    h = jnp.dot(cos_e, w1b[:half], preferred_element_type=jnp.float32)
    h += jnp.dot(sin_e, w1b[half:], preferred_element_type=jnp.float32)
    h = h * jax.nn.sigmoid(h)
    return jnp.dot(h.astype(jnp.bfloat16), w2.astype(jnp.bfloat16),
                   preferred_element_type=jnp.float32)


if __name__ == "__main__":
    key = jax.random.PRNGKey(0)
    k_t, k_w1, k_w2, k_t2 = jax.random.split(key, 4)

    # Module-default-consistent small shapes: hidden_size=32, freq_emb_size=256.
    batch = 2
    t = jax.random.uniform(k_t, (batch,), jnp.float32, 0.0, 1000.0)
    w1 = jax.random.normal(k_w1, (FREQ_EMB_SIZE, HIDDEN_SIZE), jnp.float32) * 0.02
    w2 = jax.random.normal(k_w2, (HIDDEN_SIZE, HIDDEN_SIZE), jnp.float32) * 0.02

    out = jax.block_until_ready(timestep_embedding(t, w1, w2))
    assert out.shape == (batch, HIDDEN_SIZE)
    # Tight check vs. a reference that matches the kernel's bf16 matmul inputs.
    assert jnp.allclose(out, _reference_bf16(t, w1, w2), atol=5e-4, rtol=5e-3), \
        "mismatch vs bf16 reference"
    # Loose check vs. the full-f32 PyTorch-mirroring reference (bf16 weight rounding).
    assert jnp.allclose(out, _reference_f32(t, w1, w2), atol=5e-3, rtol=5e-2), \
        "mismatch vs f32 reference"

    # Exercise the gridded / padded path (N not a multiple of the row tile, grid >= 2).
    n_big = 5000
    t_big = jax.random.uniform(k_t2, (n_big,), jnp.float32, 0.0, 1000.0)
    out_big = jax.block_until_ready(timestep_embedding(t_big, w1, w2))
    assert out_big.shape == (n_big, HIDDEN_SIZE)
    assert jnp.allclose(out_big, _reference_bf16(t_big, w1, w2), atol=5e-4, rtol=5e-3), \
        "mismatch vs bf16 reference (large N)"

    print("KERNEL_OK")
</pallas_src>

<mosaic_0001>
module attributes {stable_mosaic.version = 11 : i64} {
  func.func @timestep_embedding_kernel(%arg0: i32, %arg1: memref<8x4xf32, #tpu.memory_space<vmem>>, %arg2: memref<1x128xf32, #tpu.memory_space<vmem>>, %arg3: memref<512x128xbf16, #tpu.memory_space<vmem>>, %arg4: memref<512x128xbf16, #tpu.memory_space<vmem>>, %arg5: memref<128x128xbf16, #tpu.memory_space<vmem>>, %arg6: memref<8x128xf32, #tpu.memory_space<vmem>>) attributes {dimension_semantics = [#tpu.dimension_semantics<parallel>], iteration_bounds = array<i64: 1>, scalar_prefetch = 0 : i64, scratch_operands = 0 : i64, tpu.core_type = #tpu.core_type<tc>, window_params = [{transform_indices = @transform_0, window_bounds = array<i64: 8, 4>}, {pipeline_mode = #tpu.pipeline_mode<synchronous>, transform_indices = @transform_1, window_bounds = array<i64: 1, 128>}, {pipeline_mode = #tpu.pipeline_mode<synchronous>, transform_indices = @transform_2, window_bounds = array<i64: 512, 128>}, {pipeline_mode = #tpu.pipeline_mode<synchronous>, transform_indices = @transform_3, window_bounds = array<i64: 512, 128>}, {pipeline_mode = #tpu.pipeline_mode<synchronous>, transform_indices = @transform_4, window_bounds = array<i64: 128, 128>}, {transform_indices = @transform_5, window_bounds = array<i64: 8, 128>}]} {
    %c0 = arith.constant 0 : index
    %c0_0 = arith.constant 0 : index
    %0 = vector.load %arg2[%c0, %c0_0] : memref<1x128xf32, #tpu.memory_space<vmem>>, vector<1x128xf32>
    %c0_1 = arith.constant 0 : index
    %c0_2 = arith.constant 0 : index
    %1 = vector.load %arg1[%c0_1, %c0_2] : memref<8x4xf32, #tpu.memory_space<vmem>>, vector<8x1xf32>
    %2 = vector.broadcast %1 : vector<8x1xf32> to vector<8x128xf32>
    %3 = vector.broadcast %0 : vector<1x128xf32> to vector<8x128xf32>
    %4 = arith.mulf %2, %3 : vector<8x128xf32>
    %c0_3 = arith.constant 0 : index
    %c1 = arith.constant 1 : index
    %5 = vector.load %arg1[%c0_3, %c1] : memref<8x4xf32, #tpu.memory_space<vmem>>, vector<8x1xf32>
    %6 = vector.broadcast %5 : vector<8x1xf32> to vector<8x128xf32>
    %7 = vector.broadcast %0 : vector<1x128xf32> to vector<8x128xf32>
    %8 = arith.mulf %6, %7 : vector<8x128xf32>
    %c0_4 = arith.constant 0 : index
    %c2 = arith.constant 2 : index
    %9 = vector.load %arg1[%c0_4, %c2] : memref<8x4xf32, #tpu.memory_space<vmem>>, vector<8x1xf32>
    %10 = vector.broadcast %9 : vector<8x1xf32> to vector<8x128xf32>
    %11 = vector.broadcast %0 : vector<1x128xf32> to vector<8x128xf32>
    %12 = arith.mulf %10, %11 : vector<8x128xf32>
    %c0_5 = arith.constant 0 : index
    %c3 = arith.constant 3 : index
    %13 = vector.load %arg1[%c0_5, %c3] : memref<8x4xf32, #tpu.memory_space<vmem>>, vector<8x1xf32>
    %14 = vector.broadcast %13 : vector<8x1xf32> to vector<8x128xf32>
    %15 = vector.broadcast %0 : vector<1x128xf32> to vector<8x128xf32>
    %16 = arith.mulf %14, %15 : vector<8x128xf32>
    %17 = tpu.concatenate %4, %8, %12, %16 in 1 : vector<8x128xf32>, vector<8x128xf32>, vector<8x128xf32>, vector<8x128xf32> -> vector<8x512xf32>
    %18 = math.cos %17 : vector<8x512xf32>
    %19 = arith.truncf %18 : vector<8x512xf32> to vector<8x512xbf16>
    %20 = math.sin %17 : vector<8x512xf32>
    %21 = arith.truncf %20 : vector<8x512xf32> to vector<8x512xbf16>
    %c0_6 = arith.constant 0 : index
    %c0_7 = arith.constant 0 : index
    %22 = vector.load %arg3[%c0_6, %c0_7] : memref<512x128xbf16, #tpu.memory_space<vmem>>, vector<512x128xbf16>
    %cst = arith.constant dense<0.000000e+00> : vector<8x128xf32>
    %23 = tpu.matmul %19, %22, %cst {dimension_numbers = #tpu.dot_dimension_numbers<[1], [0], [0], [1], [0, 0, 1, 1], [], []>} : vector<8x512xbf16>, vector<512x128xbf16>, vector<8x128xf32> -> vector<8x128xf32>
    %c0_8 = arith.constant 0 : index
    %c0_9 = arith.constant 0 : index
    %24 = vector.load %arg4[%c0_8, %c0_9] : memref<512x128xbf16, #tpu.memory_space<vmem>>, vector<512x128xbf16>
    %cst_10 = arith.constant dense<0.000000e+00> : vector<8x128xf32>
    %25 = tpu.matmul %21, %24, %cst_10 {dimension_numbers = #tpu.dot_dimension_numbers<[1], [0], [0], [1], [0, 0, 1, 1], [], []>} : vector<8x512xbf16>, vector<512x128xbf16>, vector<8x128xf32> -> vector<8x128xf32>
    %26 = arith.addf %23, %25 : vector<8x128xf32>
    %27 = arith.negf %26 : vector<8x128xf32>
    %28 = math.exp %27 : vector<8x128xf32>
    %cst_11 = arith.constant 1.000000e+00 : f32
    %29 = vector.broadcast %cst_11 : f32 to vector<8x128xf32>
    %30 = arith.addf %29, %28 : vector<8x128xf32>
    %31 = arith.divf %29, %30 : vector<8x128xf32>
    %32 = arith.mulf %26, %31 : vector<8x128xf32>
    %33 = arith.truncf %32 : vector<8x128xf32> to vector<8x128xbf16>
    %c0_12 = arith.constant 0 : index
    %c0_13 = arith.constant 0 : index
    %34 = vector.load %arg5[%c0_12, %c0_13] : memref<128x128xbf16, #tpu.memory_space<vmem>>, vector<128x128xbf16>
    %cst_14 = arith.constant dense<0.000000e+00> : vector<8x128xf32>
    %35 = tpu.matmul %33, %34, %cst_14 {dimension_numbers = #tpu.dot_dimension_numbers<[1], [0], [0], [1], [0, 0, 1, 1], [], []>} : vector<8x128xbf16>, vector<128x128xbf16>, vector<8x128xf32> -> vector<8x128xf32>
    %c0_15 = arith.constant 0 : index
    %c0_16 = arith.constant 0 : index
    %36 = vector.load %arg6[%c0_15, %c0_16] : memref<8x128xf32, #tpu.memory_space<vmem>>, vector<8x128xf32>
    tpu.vector_store %arg6[%c0_15, %c0_16], %35 {strides = array<i32>} : memref<8x128xf32, #tpu.memory_space<vmem>>, vector<8x128xf32>,
    return
  }
  func.func @transform_0(%arg0: i32) -> (i32, i32) {
    %c0_i32 = arith.constant 0 : i32
    %c0_i32_0 = arith.constant 0 : i32
    return %arg0, %c0_i32 : i32, i32
  }
  func.func @transform_1(%arg0: i32) -> (i32, i32) {
    %c0_i32 = arith.constant 0 : i32
    %c0_i32_0 = arith.constant 0 : i32
    %c0_i32_1 = arith.constant 0 : i32
    return %c0_i32, %c0_i32_0 : i32, i32
  }
  func.func @transform_2(%arg0: i32) -> (i32, i32) {
    %c0_i32 = arith.constant 0 : i32
    %c0_i32_0 = arith.constant 0 : i32
    %c0_i32_1 = arith.constant 0 : i32
    return %c0_i32, %c0_i32_0 : i32, i32
  }
  func.func @transform_3(%arg0: i32) -> (i32, i32) {
    %c0_i32 = arith.constant 0 : i32
    %c0_i32_0 = arith.constant 0 : i32
    %c0_i32_1 = arith.constant 0 : i32
    return %c0_i32, %c0_i32_0 : i32, i32
  }
  func.func @transform_4(%arg0: i32) -> (i32, i32) {
    %c0_i32 = arith.constant 0 : i32
    %c0_i32_0 = arith.constant 0 : i32
    %c0_i32_1 = arith.constant 0 : i32
    return %c0_i32, %c0_i32_0 : i32, i32
  }
  func.func @transform_5(%arg0: i32) -> (i32, i32) {
    %c0_i32 = arith.constant 0 : i32
    %c0_i32_0 = arith.constant 0 : i32
    return %arg0, %c0_i32 : i32, i32
  }
}

</mosaic_0001>

<bundles_post_ra>
// kernel: tpu_custom_call.1
= control target key start
LH: loop header
LB: loop body
LE: loop exit
PB: predicated region body
PF: predicated region fallthrough
CT: control target
= control target key end

     0   :  { %10 = vsyncpa [#allocation3], 0  ;;  %s2700_s0 = inlined_call_operand.vmem [shape: f32[8,4], index: 0, kind: input, shape index: {}]   ;;  %s2701_s1 = inlined_call_operand.vmem [shape: f32[1,128], index: 1, kind: input, shape index: {}]   ;;  %s2702_s2 = inlined_call_operand.hbm [shape: bf16[512,128], index: 2, kind: input, shape index: {}]   ;;  %s2703_s3 = inlined_call_operand.hbm [shape: bf16[512,128], index: 3, kind: input, shape index: {}]   ;;  %s2704_s4 = inlined_call_operand.hbm [shape: bf16[128,128], index: 4, kind: input, shape index: {}]   ;;  %s2705_s5 = inlined_call_operand.hbm [shape: f32[8,128], index: 5, kind: output, shape index: {}]  }
   0x1   :  { %11 = vsyncpa [#allocation6], 0 }
   0x2   :  { %12 = vsyncpa [#allocation4], 0  ;;  %s2177_s18 = smov [#allocation5]   ;;  %s2178_s20 = smov [#allocation2]  }
   0x3   :  { %s34_s19 = sshll.u32 %s2177_s18, 4  ;;  %s22_s21 = sshll.u32 %s2178_s20, 4  ;;  %s35_s19 = int_to_ptr.vmem [resolvable:$true] %s34_s19  ;;  %s2225_s21 = int_to_ptr.vmem [resolvable:$true] %s22_s21 }
   0x4   :  { %s2083_s24 = scalar_lea.hbm %s2703_s3, 4096 }
   0x5   :  { %p2084_p0 = scmp.ne.s32.totalorder %s2703_s3, %s2083_s24  ;;  %p2087_p1 = scmp.lt.u32.totalorder %s2083_s24, %s2703_s3 }
   0x7   :  { %p2089_p2 = pnand %p2087_p1, %p2084_p0 }
   0x9   :  { %2092 = shalt.err (!%p2089_p2)
}
   0xa   :  { %s2093_s29 = scalar_lea.vmem %s35_s19, 4096  ;;  %p2098_p4 = scmp.lt.s32.totalorder %s35_s19, %s35_s19 }
   0xb   :  { %p2094_p3 = scmp.ne.s32.totalorder %s35_s19, %s2093_s29  ;;  %p2099_p5 = scmp.lt.s32.totalorder %s2093_s29, %s2093_s29 }
   0xd   :  { %p2100_p6 = por %p2099_p5, %p2098_p4 }
   0xf   :  { %p2101_p7 = pnand %p2100_p6, %p2094_p3 }
  0x11   :  { %2104 = shalt.err (!%p2101_p7)
}
  0x12   :  { %s2179_s30 = smov 64   ;;  %s2180_s6 = smov 4  }
  0x13   :  { %40 = dma.hbm_to_vmem [thread:$0]  %s2703_s3, 4096, %s35_s19, [#allocation6], %s2179_s30, %s2179_s30, %s2180_s6  }
  0x14   :  { %s2105_s11 = scalar_lea.hbm %s2702_s2, 4096 }
  0x15   :  { %p2106_p8 = scmp.ne.s32.totalorder %s2702_s2, %s2105_s11  ;;  %p2109_p9 = scmp.lt.u32.totalorder %s2105_s11, %s2702_s2 }
  0x17   :  { %p2111_p10 = pnand %p2109_p9, %p2106_p8 }
  0x19   :  { %2114 = shalt.err (!%p2111_p10)
}
  0x1a   :  { %s2115_s16 = scalar_lea.vmem %s2225_s21, 4096  ;;  %p2120_p12 = scmp.lt.s32.totalorder %s2225_s21, %s2225_s21 }
  0x1b   :  { %p2116_p11 = scmp.ne.s32.totalorder %s2225_s21, %s2115_s16  ;;  %p2121_p13 = scmp.lt.s32.totalorder %s2115_s16, %s2115_s16 }
  0x1d   :  { %p2122_p0 = por %p2121_p13, %p2120_p12 }
  0x1f   :  { %p2123_p1 = pnand %p2122_p0, %p2116_p11 }
  0x21   :  { %2126 = shalt.err (!%p2123_p1)
}
  0x22   :  { %28 = dma.hbm_to_vmem [thread:$0]  %s2702_s2, 4096, %s2225_s21, [#allocation3], %s2179_s30, %s2179_s30, %s2180_s6  }
  0x23   :  { %s2181_s18 = smov [#allocation7]   ;;  %s2127_s23 = scalar_lea.hbm %s2704_s4, 1024 }
  0x24   :  { %s46_s19 = sshll.u32 %s2181_s18, 4  ;;  %p2128_p2 = scmp.ne.s32.totalorder %s2704_s4, %s2127_s23  ;;  %s47_s19 = int_to_ptr.vmem [resolvable:$true] %s46_s19 }
  0x25   :  { %p2131_p3 = scmp.lt.u32.totalorder %s2127_s23, %s2704_s4 }
  0x27   :  { %p2133_p4 = pnand %p2131_p3, %p2128_p2 }
  0x29   :  { %2136 = shalt.err (!%p2133_p4)
}
  0x2a   :  { %s2137_s28 = scalar_lea.vmem %s47_s19, 1024  ;;  %p2142_p6 = scmp.lt.s32.totalorder %s47_s19, %s47_s19 }
  0x2b   :  { %p2138_p5 = scmp.ne.s32.totalorder %s47_s19, %s2137_s28  ;;  %p2143_p7 = scmp.lt.s32.totalorder %s2137_s28, %s2137_s28 }
  0x2d   :  { %p2144_p8 = por %p2143_p7, %p2142_p6 }
  0x2f   :  { %p2145_p9 = pnand %p2144_p8, %p2138_p5 }
  0x31   :  { %2148 = shalt.err (!%p2145_p9)
}
  0x32   :  { %52 = dma.hbm_to_vmem [thread:$0]  %s2704_s4, 1024, %s47_s19, [#allocation6], %s2179_s30, %s2179_s30, %s2180_s6  }
  0x33   :  { %2171 = dma.done.wait [#allocation3], 4096  }
  0x34   :  { %2172 = vsyncadd [#allocation3], 4294963200 }
  0x35   :  { %2173 = dma.done.wait [#allocation6], 5120  }
  0x36   :  { %2174 = vsyncadd [#allocation6], 4294962176  ;;  %v2182_v0 = vmov 3   ;;  %v2183_v1 = vmov 1   ;;  %v64_v2 = vld [vmem:[%s2700_s0] sm:$0xff]  ;;  %v2184_v3 = vmov 2  }
  0x37   :  { %1988 = vset.pattern.permute.xlu1 %v2182_v0  ;;  %1986 = vset.pattern.permute.xlu0 %v2183_v1  ;;  %v2185_v4 = vmov 0   ;;  %v1991_v5 = vld [vmem:[#allocation5 + $0x40] sm:$0xff]   ;;  %v1995_v9 = vld [vmem:[#allocation5 + $0x48] sm:$0xff]   ;;  %v1999_v13 = vld [vmem:[#allocation5 + $0x50] sm:$0xff]  }
  0x38   :  { %88 = vperm.xlu1 %1988, %v64_v2   ;;  %78 = vperm.xlu0 %1986, %v64_v2   ;;  %v1992_v6 = vld [vmem:[#allocation5 + $0xc0] sm:$0xff]   ;;  %v1996_v10 = vld [vmem:[#allocation5 + $0xc8] sm:$0xff]   ;;  %v2000_v14 = vld [vmem:[#allocation5 + $0xd0] sm:$0xff]  }
  0x39   :  { %v1993_v7 = vld [vmem:[#allocation5] sm:$0xff]   ;;  %1835 = vmatprep.subr.bf16.mxu0 %v1991_v5  ;;  %1857 = vmatprep.subr.bf16.mxu1 %v1992_v6  ;;  %v1997_v11 = vld [vmem:[#allocation5 + $0x8] sm:$0xff]   ;;  %v2001_v15 = vld [vmem:[#allocation5 + $0x10] sm:$0xff]  }
  0x3a   :  { %v1994_v8 = vld [vmem:[#allocation5 + $0x80] sm:$0xff]   ;;  %1836 = vmatpush3.bf16.msra.mxu0 %v1993_v7  ;;  %v1998_v12 = vld [vmem:[#allocation5 + $0x88] sm:$0xff]   ;;  %v2002_v16 = vld [vmem:[#allocation5 + $0x90] sm:$0xff]  }
  0x3b   :  { %1858 = vmatpush3.bf16.msra.mxu1 %v1994_v8  ;;  %1837 = vmatprep.subr.bf16.mxu0 %v1995_v9  ;;  %v2003_v17 = vld [vmem:[#allocation5 + $0x58] sm:$0xff]   ;;  %v2007_v21 = vld [vmem:[#allocation5 + $0x60] sm:$0xff]   ;;  %v2011_v25 = vld [vmem:[#allocation5 + $0x68] sm:$0xff]  }
  0x3c   :  { %1989 = vset.pattern.permute.xlu1 %v2184_v3  ;;  %1987 = vset.pattern.permute.xlu0 %v2185_v4  ;;  %v2004_v18 = vld [vmem:[#allocation5 + $0xd8] sm:$0xff]   ;;  %v2008_v22 = vld [vmem:[#allocation5 + $0xe0] sm:$0xff]   ;;  %v2012_v26 = vld [vmem:[#allocation5 + $0xe8] sm:$0xff]  }
  0x3d   :  { %83 = vperm.xlu1 %1989, %v64_v2   ;;  %67 = vperm.xlu0 %1987, %v64_v2   ;;  %v2005_v19 = vld [vmem:[#allocation5 + $0x18] sm:$0xff]   ;;  %v2009_v23 = vld [vmem:[#allocation5 + $0x20] sm:$0xff]   ;;  %v2013_v27 = vld [vmem:[#allocation5 + $0x28] sm:$0xff]  }
  0x3e   :  { %1859 = vmatprep.subr.bf16.mxu1 %v1996_v10  ;;  %1838 = vmatpush3.bf16.msra.mxu0 %v1997_v11  ;;  %v2006_v20 = vld [vmem:[#allocation5 + $0x98] sm:$0xff]   ;;  %v2010_v24 = vld [vmem:[#allocation5 + $0xa0] sm:$0xff]   ;;  %v2014_v28 = vld [vmem:[#allocation5 + $0xa8] sm:$0xff]  }
  0x3f   :  { %1860 = vmatpush3.bf16.msra.mxu1 %v1998_v12  ;;  %1839 = vmatprep.subr.bf16.mxu0 %v1999_v13  ;;  %v2015_v29 = vld [vmem:[#allocation5 + $0x70] sm:$0xff]   ;;  %v2019_v33 = vld [vmem:[#allocation5 + $0x78] sm:$0xff]   ;;  %v1729_v35 = vld [vmem:[%s2701_s1] ss:$0 sm:$0xff]  ;;  %s2194_s1 = smov [#allocation8]  }
  0x40   :  { %1861 = vmatprep.subr.bf16.mxu1 %v2000_v14  ;;  %v2016_v30 = vld [vmem:[#allocation5 + $0xf0] sm:$0xff]   ;;  %v2020_v34 = vld [vmem:[#allocation5 + $0xf8] sm:$0xff]   ;;  %v2023_v44 = vld [vmem:[#allocation2 + $0x40] sm:$0xff]   ;;  %s1719_s30 = sshll.u32 %s2194_s1, 4  ;;  %s1720_s30 = int_to_ptr.vmem [resolvable:$true] %s1719_s30 }
  0x41   :  { %1990 = vset.pattern.permute.xlu0 %v2182_v0  ;;  %v2017_v31 = vld [vmem:[#allocation5 + $0x30] sm:$0xff]   ;;  %v2021_v42 = vld [vmem:[#allocation5 + $0x38] sm:$0xff]   ;;  %v2024_v45 = vld [vmem:[#allocation2 + $0xc0] sm:$0xff]   ;;  %s2149_s6 = scalar_lea.vmem %s1720_s30, 128  ;;  %p2154_p11 = scmp.lt.s32.totalorder %s1720_s30, %s1720_s30 }
  0x42   :  { %1840 = vmatpush3.bf16.msra.mxu0 %v2001_v15  ;;  %v2018_v32 = vld [vmem:[#allocation5 + $0xb0] sm:$0xff]   ;;  %v2022_v43 = vld [vmem:[#allocation5 + $0xb8] sm:$0xff]   ;;  %p2150_p10 = scmp.ne.s32.totalorder %s1720_s30, %s2149_s6  ;;  %p2155_p12 = scmp.lt.s32.totalorder %s2149_s6, %s2149_s6 }
  0x43   :  { %1862 = vmatpush3.bf16.msra.mxu1 %v2002_v16  ;;  %1841 = vmatprep.subr.bf16.mxu0 %v2003_v17 }
  0x44   :  { %1863 = vmatprep.subr.bf16.mxu1 %v2004_v18  ;;  %p2156_p13 = por %p2155_p12, %p2154_p11 }
  0x46   :  { %1842 = vmatpush3.bf16.msra.mxu0 %v2005_v19  ;;  %v2186_v19 = vmov 2102212464   ;;  %p2157_p0 = pnand %p2156_p13, %p2150_p10 }
  0x47   :  { %1864 = vmatpush3.bf16.msra.mxu1 %v2006_v20  ;;  %1843 = vmatprep.subr.bf16.mxu0 %v2007_v21  ;;  %v2187_v21 = vmov 920167782  }
  0x48   :  { %1865 = vmatprep.subr.bf16.mxu1 %v2008_v22 }
  0x4a   :  { %1844 = vmatpush3.bf16.msra.mxu0 %v2009_v23 }
  0x4b   :  { %1866 = vmatpush3.bf16.msra.mxu1 %v2010_v24  ;;  %1845 = vmatprep.subr.bf16.mxu0 %v2011_v25 }
  0x4c   :  { %1867 = vmatprep.subr.bf16.mxu1 %v2012_v26  ;;  %v2188_v26 = vmov 1326507024  }
  0x4e   :  { %1846 = vmatpush3.bf16.msra.mxu0 %v2013_v27 }
  0x4f   :  { %1868 = vmatpush3.bf16.msra.mxu1 %v2014_v28  ;;  %1847 = vmatprep.subr.bf16.mxu0 %v2015_v29 }
  0x50   :  { %1869 = vmatprep.subr.bf16.mxu1 %v2016_v30 }
  0x52   :  { %1848 = vmatpush3.bf16.msra.mxu0 %v2017_v31 }
  0x53   :  { %1870 = vmatpush3.bf16.msra.mxu1 %v2018_v32  ;;  %1849 = vmatprep.subr.bf16.mxu0 %v2019_v33  ;;  %v2189_v33 = vmov 683565275  }
  0x54   :  { %1871 = vmatprep.subr.bf16.mxu1 %v2020_v34 }
  0x56   :  { %1850 = vmatpush3.bf16.msra.mxu0 %v2021_v42 }
  0x57   :  { %1872 = vmatpush3.bf16.msra.mxu1 %v2022_v43  ;;  %1879 = vmatprep.subr.bf16.mxu0 %v2023_v44 }
  0x58   :  { %1901 = vmatprep.subr.bf16.mxu1 %v2024_v45 }
  0xb7   :  { %v89_v36 = vpop.permute.xlu1 %88  ;;  %v79_v37 = vpop.permute.xlu0 %78 }
  0xb8   :  { %v2283_v38 = vmul.f32 %v1729_v35, %v89_v36  ;;  %v2285_v39 = vmul.f32 %v1729_v35, %v79_v37  ;;  %v2190_v36 = vmov 2475754826  }
  0xba   :  { %v404_v40 = vand.u32 2139095040, %v2283_v38  ;;  %v198_v41 = vand.u32 2139095040, %v2285_v39  ;;  %v195_v50 = vand.u32 2147483647, %v2285_v39  ;;  %v401_v14 = vand.u32 2147483647, %v2283_v38 }
  0xbc   :  { %v405_v46 = vshrl.u32 %v404_v40, 23  ;;  %v199_v47 = vshrl.u32 %v198_v41, 23  ;;  %v84_v48 = vpop.permute.xlu1 %83  ;;  %v68_v49 = vpop.permute.xlu0 %67  ;;  %v202_v60 = vand.u32 8388607, %v195_v50  ;;  %v2191_v40 = vmov 2131351028  }
  0xbd   :  { %v2290_v51 = vmul.f32 %v1729_v35, %v84_v48  ;;  %v2292_v52 = vmul.f32 %v1729_v35, %v68_v49 }
  0xbe   :  { %v1742_v53 = vadd.s32 4294967169, %v405_v46  ;;  %v1734_v54 = vadd.s32 4294967169, %v199_v47  ;;  %v203_v6 = vor.u32 8388608, %v202_v60 }
  0xbf   :  { %v298_v55 = vand.u32 2147483647, %v2290_v51  ;;  %v301_v56 = vand.u32 2139095040, %v2290_v51  ;;  %v95_v59 = vand.u32 2139095040, %v2292_v52  ;;  %v92_v3 = vand.u32 2147483647, %v2292_v52 }
  0xc0   :  { %v411_v57 = vadd.s32 1, %v1742_v53  ;;  %v205_v58 = vadd.s32 1, %v1734_v54  ;;  %v2319_v13 = vshll.u32 %v203_v6, 8 }
  0xc1   :  { %v302_v61 = vshrl.u32 %v301_v56, 23  ;;  %v305_v62 = vand.u32 8388607, %v298_v55  ;;  %v96_v63 = vshrl.u32 %v95_v59, 23  ;;  %v2314_v11 = vand.u32 8388607, %v92_v3 }
  0xc2   :  { %vm412_vm0 = vcmp.gt.s32.totalorder %v411_v57, 0  ;;  %vm206_vm1 = vcmp.gt.s32.totalorder %v205_v58, 0 }
  0xc3   :  { %v2301_v0 = vsel %vm412_vm0, %v411_v57, 0  ;;  %v207_v1 = vsel %vm206_vm1, %v205_v58, 0  ;;  %v1738_v2 = vadd.s32 4294967169, %v302_v61  ;;  %v306_v7 = vor.u32 8388608, %v305_v62 }
  0xc4   :  { %v2305_v4 = vand.u32 31, %v2301_v0  ;;  %v2307_v5 = vand.u32 31, %v207_v1  ;;  %v1730_v9 = vadd.s32 4294967169, %v96_v63  ;;  %v2322_v15 = vshrl.u32 %v207_v1, 5 }
  0xc5   :  { %v308_v8 = vadd.s32 1, %v1738_v2  ;;  %v2324_v17 = vshll.u32 %v306_v7, 8  ;;  %v100_v29 = vor.u32 8388608, %v2314_v11 }
  0xc6   :  { %v2310_v10 = vsub.s32 32, %v2305_v4  ;;  %v2317_v12 = vsub.s32 32, %v2307_v5  ;;  %v102_v18 = vadd.s32 1, %v1730_v9  ;;  %v2328_v20 = vshll.u32 %v2186_v19, %v2305_v4 }
  0xc7   :  { %vm309_vm2 = vcmp.gt.s32.totalorder %v308_v8, 0  ;;  %v2332_v22 = vshll.u32 %v2187_v21, %v2305_v4  ;;  %v221_v23 = vshll.u32 %v2186_v19, %v2307_v5  ;;  %v224_v28 = vshll.u32 %v2187_v21, %v2307_v5 }
  0xc8   :  { %v310_v16 = vsel %vm309_vm2, %v308_v8, 0  ;;  %v2338_v25 = vshrl.u32 %v2187_v21, %v2310_v10  ;;  %v2342_v27 = vshrl.u32 %v2188_v26, %v2310_v10  ;;  %v222_v30 = vshrl.u32 %v2187_v21, %v2317_v12 }
  0xc9   :  { %v312_v24 = vand.u32 31, %v310_v16  ;;  %v311_v31 = vshrl.u32 %v310_v16, 5  ;;  %v225_v35 = vshrl.u32 %v2188_v26, %v2317_v12  ;;  %vm103_vm3 = vcmp.gt.s32.totalorder %v102_v18, 0 }
  0xca   :  { %vm230_vm4 = vcmp.lt.s32.totalorder %v2322_v15, 4  ;;  %v104_v9 = vsel %vm103_vm3, %v102_v18, 0  ;;  %vm227_vm14 = vcmp.lt.s32.totalorder %v2322_v15, 1  ;;  %vm229_vm15 = vcmp.lt.s32.totalorder %v2322_v15, 3 }
  0xcb   :  { %v313_v32 = vsub.s32 32, %v312_v24  ;;  %v315_v34 = vshll.u32 %v2189_v33, %v312_v24  ;;  %v318_v37 = vshll.u32 %v2190_v36, %v312_v24  ;;  %v321_v41 = vshll.u32 %v2191_v40, %v312_v24 }
  0xcc   :  { %v324_v46 = vshll.u32 %v2186_v19, %v312_v24  ;;  %v327_v48 = vshll.u32 %v2187_v21, %v312_v24  ;;  %vm330_vm5 = vcmp.lt.s32.totalorder %v311_v31, 1  ;;  %vm331_vm6 = vcmp.lt.s32.totalorder %v311_v31, 2 }
  0xcd   :  { %v314_v42 = vshrl.u32 %v2189_v33, %v313_v32  ;;  %v316_v43 = vshrl.u32 %v2190_v36, %v313_v32  ;;  %v319_v44 = vshrl.u32 %v2191_v40, %v313_v32  ;;  %v322_v45 = vshrl.u32 %v2186_v19, %v313_v32 }
  0xce   :  { %v325_v47 = vshrl.u32 %v2187_v21, %v313_v32  ;;  %v328_v49 = vshrl.u32 %v2188_v26, %v313_v32  ;;  %vm332_vm7 = vcmp.lt.s32.totalorder %v311_v31, 3  ;;  %vm333_vm8 = vcmp.lt.s32.totalorder %v311_v31, 4 }
  0xcf   :  { %v317_v53 = vor.u32 %v316_v43, %v315_v34  ;;  %v320_v54 = vor.u32 %v319_v44, %v318_v37  ;;  %v323_v56 = vor.u32 %v322_v45, %v321_v41  ;;  %v226_v62 = vor.u32 %v225_v35, %v224_v28 }
  0xd0   :  { %v326_v57 = vor.u32 %v325_v47, %v324_v46  ;;  %v329_v58 = vor.u32 %v328_v49, %v327_v48  ;;  %v105_v32 = vshrl.u32 %v104_v9, 5  ;;  %v2376_v41 = vor.u32 %v222_v30, %v221_v23 }
  0xd1   :  { %v334_v59 = vsel %vm330_vm5, %v314_v42, %v317_v53  ;;  %v338_v60 = vsel %vm330_vm5, %v317_v53, %v320_v54  ;;  %v342_v61 = vsel %vm330_vm5, %v320_v54, %v323_v56  ;;  %v335_v63 = vsel %vm333_vm8, %v323_v56, 2102212464 }
  0xd2   :  { %v339_v1 = vsel %vm333_vm8, %v326_v57, 920167782  ;;  %v343_v2 = vsel %vm333_vm8, %v329_v58, 1326507024  ;;  %v336_v6 = vsel %vm332_vm7, %v320_v54, %v335_v63  ;;  %v2380_v18 = vsel %vm230_vm4, %v226_v62, 1326507024 }
  0xd3   :  { %v340_v7 = vsel %vm332_vm7, %v323_v56, %v339_v1  ;;  %v344_v8 = vsel %vm332_vm7, %v326_v57, %v343_v2  ;;  %v337_v11 = vsel %vm331_vm6, %v334_v59, %v336_v6  ;;  %v106_v42 = vand.u32 31, %v104_v9 }
  0xd4   :  { %v341_v16 = vsel %vm331_vm6, %v338_v60, %v340_v7  ;;  %v345_v24 = vsel %vm331_vm6, %v342_v61, %v344_v8  ;;  %v2382_v43 = vshll.u32 %v100_v29, 8  ;;  %v353_v31 = vmul.u32 %v2324_v17, %v337_v11 }
  0xd5   :  { %v2368_v34 = vmul.u32.u64.low %v2324_v17, %v345_v24  ;;  %v2369_v37 = vmul.u32.u64.high %v2324_v17, %v345_v24, %v2368_v34  ;;  %v2372_v28 = vmul.u32.u64.low %v2324_v17, %v341_v16  ;;  %v2373_v35 = vmul.u32.u64.high %v2324_v17, %v341_v16, %v2372_v28 }
  0xd6   :  { %vm124_vm9 = vcmp.lt.s32.totalorder %v105_v32, 1  ;;  %vm126_vm10 = vcmp.lt.s32.totalorder %v105_v32, 3  ;;  %v212_v44 = vshll.u32 %v2189_v33, %v2307_v5  ;;  %v107_v45 = vsub.s32 32, %v106_v42 }
  0xd7   :  { %v109_v46 = vshll.u32 %v2189_v33, %v106_v42  ;;  %v112_v23 = vshll.u32 %v2190_v36, %v106_v42  ;;  %vm125_vm11 = vcmp.lt.s32.totalorder %v105_v32, 2  ;;  %v213_v30 = vshrl.u32 %v2190_v36, %v2317_v12 }
  0xd8   :  { %vm355_vm12 = vc.u32 %v2369_v37, %v2372_v28  ;;  %v356_v29 = vadd.s32 1, %v2373_v35  ;;  %v115_v17 = vshll.u32 %v2191_v40, %v106_v42  ;;  %v118_v47 = vshll.u32 %v2186_v19, %v106_v42 }
  0xd9   :  { %v108_v48 = vshrl.u32 %v2189_v33, %v107_v45  ;;  %v110_v49 = vshrl.u32 %v2190_v36, %v107_v45  ;;  %v113_v53 = vshrl.u32 %v2191_v40, %v107_v45  ;;  %v116_v54 = vshrl.u32 %v2186_v19, %v107_v45 }
  0xda   :  { %v357_v56 = vsel %vm355_vm12, %v356_v29, %v2373_v35  ;;  %v119_v57 = vshrl.u32 %v2187_v21, %v107_v45  ;;  %v121_v58 = vshll.u32 %v2187_v21, %v106_v42  ;;  %v122_v59 = vshrl.u32 %v2188_v26, %v107_v45 }
  0xdb   :  { %v358_v60 = vadd.s32 %v357_v56, %v353_v31  ;;  %v111_v61 = vor.u32 %v110_v49, %v109_v46  ;;  %v114_v62 = vor.u32 %v113_v53, %v112_v23  ;;  %v117_v63 = vor.u32 %v116_v54, %v115_v17 }
  0xdc   :  { %v120_v1 = vor.u32 %v119_v57, %v118_v47  ;;  %v123_v2 = vor.u32 %v122_v59, %v121_v58  ;;  %vm127_vm13 = vcmp.lt.s32.totalorder %v105_v32, 4  ;;  %v214_v6 = vor.u32 %v213_v30, %v212_v44 }
  0xdd   :  { %v359_v7 = vadd.s32 536870912, %v358_v60  ;;  %v128_v8 = vsel %vm124_vm9, %v108_v48, %v111_v61  ;;  %v129_v9 = vsel %vm127_vm13, %v117_v63, 2102212464  ;;  %v132_v11 = vsel %vm124_vm9, %v111_v61, %v114_v62 }
  0xde   :  { %v130_v16 = vsel %vm126_vm10, %v114_v62, %v129_v9  ;;  %v133_v24 = vsel %vm127_vm13, %v120_v1, 920167782  ;;  %v136_v21 = vsel %vm124_vm9, %v114_v62, %v117_v63  ;;  %v137_v26 = vsel %vm127_vm13, %v123_v2, 1326507024 }
  0xdf   :  { %v2408_v34 = vshrl.u32 %v359_v7, 30  ;;  %v134_v35 = vsel %vm126_vm10, %v117_v63, %v133_v24  ;;  %v138_v42 = vsel %vm126_vm10, %v120_v1, %v137_v26  ;;  %v215_v31 = vshll.u32 %v2190_v36, %v2307_v5 }
  0xe0   :  { %v131_v44 = vsel %vm125_vm11, %v128_v8, %v130_v16  ;;  %v135_v45 = vsel %vm125_vm11, %v132_v11, %v134_v35  ;;  %v139_v46 = vsel %vm125_vm11, %v136_v21, %v138_v42  ;;  %v216_v23 = vshrl.u32 %v2191_v40, %v2317_v12 }
  0xe1   :  { %v361_v30 = vshll.u32 %v2408_v34, 30  ;;  %v2421_v29 = vmul.u32.u64.low %v2382_v43, %v139_v46  ;;  %v2422_v17 = vmul.u32.u64.high %v2382_v43, %v139_v46, %v2421_v29  ;;  %v218_v47 = vshll.u32 %v2191_v40, %v2307_v5 }
  0xe2   :  { %v2427_v48 = vmul.u32.u64.low %v2382_v43, %v135_v45  ;;  %v2428_v49 = vmul.u32.u64.high %v2382_v43, %v135_v45, %v2427_v48  ;;  %v217_v53 = vor.u32 %v216_v23, %v215_v31  ;;  %v219_v32 = vshrl.u32 %v2186_v19, %v2317_v12 }
  0xe3   :  { %v236_v54 = vsel %vm230_vm4, %v2376_v41, 920167782  ;;  %v2436_v56 = vsub.s32 %v358_v60, %v361_v30  ;;  %v211_v5 = vshrl.u32 %v2189_v33, %v2317_v12  ;;  %v241_v59 = vsel %vm229_vm15, %v2376_v41, %v2380_v18 }
  0xe4   :  { %v220_v57 = vor.u32 %v219_v32, %v218_v47  ;;  %v235_v58 = vsel %vm227_vm14, %v214_v6, %v217_v53  ;;  %v147_v60 = vmul.u32 %v2382_v43, %v131_v44  ;;  %vm149_vm0 = vc.u32 %v2422_v17, %v2427_v48 }
  0xe5   :  { %v364_v61 = vsub.s32 0, %v2436_v56  ;;  %vm228_vm1 = vcmp.lt.s32.totalorder %v2322_v15, 2  ;;  %v150_v12 = vadd.s32 1, %v2428_v49  ;;  %v231_v43 = vsel %vm227_vm14, %v211_v5, %v214_v6 }
  0xe6   :  { %v232_v62 = vsel %vm230_vm4, %v220_v57, 2102212464  ;;  %v237_v63 = vsel %vm229_vm15, %v220_v57, %v236_v54  ;;  %v239_v41 = vsel %vm227_vm14, %v217_v53, %v220_v57  ;;  %v2480_v26 = vshrl.u32 %v2301_v0, 5 }
  0xe7   :  { %v1739_v18 = vmin.u32 %v364_v61, %v2436_v56  ;;  %v238_v1 = vsel %vm228_vm1, %v235_v58, %v237_v63  ;;  %v242_v2 = vsel %vm228_vm1, %v239_v41, %v241_v59  ;;  %v151_v7 = vsel %vm149_vm0, %v150_v12, %v2428_v49 }
  0xe8   :  { %v233_v8 = vsel %vm229_vm15, %v217_v53, %v232_v62  ;;  %v2471_v9 = vmul.u32.u64.low %v2319_v13, %v242_v2  ;;  %v2472_v11 = vmul.u32.u64.high %v2319_v13, %v242_v2, %v2471_v9  ;;  %v152_v24 = vadd.s32 %v151_v7, %v147_v60 }
  0xe9   :  { %v366_v16 = vclz %v1739_v18  ;;  %v2475_v21 = vmul.u32.u64.low %v2319_v13, %v238_v1  ;;  %v2476_v6 = vmul.u32.u64.high %v2319_v13, %v238_v1, %v2475_v21  ;;  %v429_v35 = vor.u32 %v2338_v25, %v2328_v20 }
  0xea   :  { %v418_v42 = vshll.u32 %v2189_v33, %v2305_v4  ;;  %v419_v31 = vshrl.u32 %v2190_v36, %v2310_v10  ;;  %v153_v45 = vadd.s32 536870912, %v152_v24  ;;  %v421_v46 = vshll.u32 %v2190_v36, %v2305_v4 }
  0xeb   :  { %v1740_v44 = vadd.s32 4294967294, %v366_v16  ;;  %v422_v23 = vshrl.u32 %v2191_v40, %v2310_v10  ;;  %v432_v0 = vor.u32 %v2342_v27, %v2332_v22  ;;  %v234_v20 = vsel %vm228_vm1, %v231_v43, %v233_v8 }
  0xec   :  { %v408_v25 = vand.u32 8388607, %v401_v14  ;;  %v424_v30 = vshll.u32 %v2191_v40, %v2305_v4  ;;  %v2500_v29 = vshrl.u32 %v153_v45, 30  ;;  %vm252_vm2 = vc.u32 %v2472_v11, %v2475_v21 }
  0xed   :  { %v253_v36 = vadd.s32 1, %v2476_v6  ;;  %vm436_vm3 = vcmp.lt.s32.totalorder %v2480_v26, 4  ;;  %v420_v47 = vor.u32 %v419_v31, %v418_v42  ;;  %v423_v22 = vor.u32 %v422_v23, %v421_v46 }
  0xee   :  { %v425_v15 = vshrl.u32 %v2186_v19, %v2310_v10  ;;  %v442_v27 = vsel %vm436_vm3, %v429_v35, 920167782  ;;  %vm1741_vm4 = vcmp.lt.s32.totalorder %v1740_v44, 0  ;;  %v155_v4 = vshll.u32 %v2500_v29, 30 }
  0xef   :  { %v250_v40 = vmul.u32 %v2319_v13, %v234_v20  ;;  %v446_v49 = vsel %vm436_vm3, %v432_v0, 1326507024  ;;  %v254_v53 = vsel %vm252_vm2, %v253_v36, %v2476_v6  ;;  %v409_v32 = vor.u32 8388608, %v408_v25 }
  0xf0   :  { %v426_v54 = vor.u32 %v425_v15, %v424_v30  ;;  %v156_v5 = vsub.s32 %v152_v24, %v155_v4  ;;  %vm433_vm5 = vcmp.lt.s32.totalorder %v2480_v26, 1  ;;  %vm435_vm6 = vcmp.lt.s32.totalorder %v2480_v26, 3 }
  0xf1   :  { %v255_v57 = vadd.s32 %v254_v53, %v250_v40  ;;  %v369_v19 = vsel %vm1741_vm4, 0, %v1740_v44  ;;  %v441_v58 = vsel %vm433_vm5, %v420_v47, %v423_v22  ;;  %vm434_vm7 = vcmp.lt.s32.totalorder %v2480_v26, 2 }
  0xf2   :  { %v443_v13 = vsel %vm435_vm6, %v426_v54, %v442_v27  ;;  %v158_v59 = vsub.s32 0, %v156_v5  ;;  %v445_v60 = vsel %vm433_vm5, %v423_v22, %v426_v54  ;;  %v447_v62 = vsel %vm435_vm6, %v429_v35, %v446_v49 }
  0xf3   :  { %v256_v61 = vadd.s32 536870912, %v255_v57  ;;  %v444_v12 = vsel %vm434_vm7, %v441_v58, %v443_v13  ;;  %v449_v63 = vshll.u32 %v409_v32, 8  ;;  %v374_v41 = vsub.s32 4294967266, %v369_v19 }
  0xf4   :  { %v1731_v18 = vmin.u32 %v158_v59, %v156_v5  ;;  %v417_v1 = vshrl.u32 %v2189_v33, %v2310_v10  ;;  %v438_v2 = vsel %vm436_vm3, %v426_v54, 2102212464  ;;  %v448_v7 = vsel %vm434_vm7, %v445_v60, %v447_v62 }
  0xf5   :  { %v2528_v43 = vshrl.u32 %v256_v61, 30  ;;  %v2536_v8 = vmul.u32.u64.low %v449_v63, %v444_v12  ;;  %v2537_v9 = vmul.u32.u64.high %v449_v63, %v444_v12, %v2536_v8  ;;  %v439_v33 = vsel %vm435_vm6, %v423_v22, %v438_v2 }
  0xf6   :  { %v160_v16 = vclz %v1731_v18  ;;  %v2541_v6 = vmul.u32.u64.low %v449_v63, %v448_v7  ;;  %v2542_v35 = vmul.u32.u64.high %v449_v63, %v448_v7, %v2541_v6  ;;  %v437_v10 = vsel %vm433_vm5, %v417_v1, %v420_v47 }
  0xf7   :  { %v258_v24 = vshll.u32 %v2528_v43, 30  ;;  %v375_v44 = vadd.s32 127, %v374_v41  ;;  %v370_v46 = vsub.s32 32, %v369_v19  ;;  %v440_v0 = vsel %vm434_vm7, %v437_v10, %v439_v33 }
  0xf8   :  { %v1732_v42 = vadd.s32 4294967294, %v160_v16  ;;  %v459_v20 = vadd.s32 1, %v2537_v9  ;;  %v148_v25 = vadd.s32 %v2427_v48, %v2422_v17  ;;  %vm458_vm9 = vc.u32 %v2542_v35, %v2536_v8 }
  0xf9   :  { %v259_v31 = vsub.s32 %v255_v57, %v258_v24  ;;  %v354_v47 = vadd.s32 %v2372_v28, %v2369_v37  ;;  %v376_v22 = vshll.u32 %v375_v44, 23  ;;  %v456_v26 = vmul.u32 %v449_v63, %v440_v0 }
  0xfa   :  { %vm1733_vm8 = vcmp.lt.s32.totalorder %v1732_v42, 0  ;;  %v460_v32 = vsel %vm458_vm9, %v459_v20, %v2537_v9  ;;  %v371_v57 = vshll.u32 %v2436_v56, %v369_v19  ;;  %v251_v62 = vadd.s32 %v2475_v21, %v2472_v11 }
  0xfb   :  { %v261_v45 = vsub.s32 0, %v259_v31  ;;  %v163_v23 = vsel %vm1733_vm8, 0, %v1732_v42  ;;  %v372_v49 = vshrl.u32 %v354_v47, %v370_v46  ;;  %v461_v48 = vadd.s32 %v460_v32, %v456_v26 }
  0xfc   :  { %v164_v30 = vsub.s32 32, %v163_v23  ;;  %v168_v36 = vsub.s32 4294967266, %v163_v23  ;;  %v165_v27 = vshll.u32 %v156_v5, %v163_v23  ;;  %v377_v13 = vor.u32 4788187, %v376_v22 }
  0xfd   :  { %v1735_v15 = vmin.u32 %v261_v45, %v259_v31  ;;  %v462_v61 = vadd.s32 536870912, %v461_v48  ;;  %v373_v37 = vor.u32 %v372_v49, %v371_v57  ;;  %vm94_vm11 = vcmp.lt.s32.totalorder %v2292_v52, 0 }
  0xfe   :  { %v166_v4 = vshrl.u32 %v148_v25, %v164_v30  ;;  %v169_v40 = vadd.s32 127, %v168_v36  ;;  %v378_v18 = vand.u32 2147483647, %v377_v13  ;;  %v178_v10 = vsub.s32 4, %v2500_v29 }
  0xff   :  { %v263_v53 = vclz %v1735_v15  ;;  %v2559_v12 = vshrl.u32 %v462_v61, 30  ;;  %v380_v9 = vcvt.s32.f32 %v373_v37  ;;  %vm2568_vm12 = vcmp.le.f32.partialorder %v92_v3, 0.7853982 }
 0x100   :  { %v167_v54 = vor.u32 %v166_v4, %v165_v27  ;;  %v170_v17 = vshll.u32 %v169_v40, 23  ;;  %v281_v46 = vsub.s32 4, %v2528_v43  ;;  %v179_v3 = vsel %vm94_vm11, %v178_v10, %v2500_v29 }
 0x101   :  { %v1736_v58 = vadd.s32 4294967294, %v263_v53  ;;  %v464_v56 = vshll.u32 %v2559_v12, 30  ;;  %v381_v33 = vmul.f32 %v380_v9, %v378_v18  ;;  %vm197_vm13 = vcmp.lt.s32.totalorder %v2285_v39, 0 }
 0x102   :  { %v171_v59 = vor.u32 4788187, %v170_v17  ;;  %v174_v5 = vcvt.s32.f32 %v167_v54  ;;  %v282_v47 = vsel %vm197_vm13, %v281_v46, %v2528_v43  ;;  %v2585_v15 = vsel %vm2568_vm12, 0, %v179_v3 }
 0x103   :  { %vm1737_vm10 = vcmp.lt.s32.totalorder %v1736_v58, 0  ;;  %v465_v24 = vsub.s32 %v461_v48, %v464_v56  ;;  %v382_v25 = vxor.u32 2147483648, %v381_v33  ;;  %vm300_vm14 = vcmp.lt.s32.totalorder %v2290_v51, 0 }
 0x104   :  { %v172_v28 = vand.u32 2147483647, %v171_v59  ;;  %v266_v60 = vsel %vm1737_vm10, 0, %v1736_v58  ;;  %vm2590_vm15 = vcmp.le.f32.partialorder %v298_v55, 0.7853982  ;;  %v601_v49 = vadd.s32 3, %v2585_v15 }
 0x105   :  { %v267_v63 = vsub.s32 32, %v266_v60  ;;  %v271_v41 = vsub.s32 4294967266, %v266_v60  ;;  %v268_v19 = vshll.u32 %v259_v31, %v266_v60  ;;  %v467_v31 = vsub.s32 0, %v465_v24 }
 0x106   :  { %v175_v1 = vmul.f32 %v174_v5, %v172_v28  ;;  %v383_v29 = vsel %vm300_vm14, %v382_v25, %v381_v33  ;;  %vm196_vm0 = vcmp.le.f32.partialorder %v195_v50, 0.7853982  ;;  %v457_v55 = vadd.s32 %v2536_v8, %v2542_v35 }
 0x107   :  { %v269_v2 = vshrl.u32 %v251_v62, %v267_v63  ;;  %v272_v7 = vadd.s32 127, %v271_v41  ;;  %v1743_v23 = vmin.u32 %v467_v31, %v465_v24  ;;  %v284_v40 = vsel %vm196_vm0, 0, %v282_v47 }
 0x108   :  { %v176_v16 = vxor.u32 2147483648, %v175_v1  ;;  %v386_v17 = vsel %vm2590_vm15, %v2290_v51, %v383_v29  ;;  %v705_v59 = vadd.s32 3, %v284_v40  ;;  %v602_v61 = vand.u32 3, %v601_v49  ;;  %v2025_v29 = vld [vmem:[#allocation2] sm:$0xff]  }
 0x109   :  { %v270_v6 = vor.u32 %v269_v2, %v268_v19  ;;  %v273_v42 = vshll.u32 %v272_v7, 23  ;;  %v469_v30 = vclz %v1743_v23  ;;  %v384_v37 = vsub.s32 4, %v2408_v34 }
 0x10a   :  { %v177_v21 = vsel %vm94_vm11, %v176_v16, %v175_v1  ;;  %v288_v60 = vand.u32 3, %v284_v40  ;;  %v706_v63 = vand.u32 3, %v705_v59  ;;  %vm604_vm2 = vcmp.eq.s32.totalorder %v602_v61, 0  ;;  %v2033_v59 = vld [vmem:[#allocation2 + $0x10] sm:$0xff]  }
 0x10b   :  { %v180_v44 = vsel %vm2568_vm12, %v2292_v52, %v177_v21  ;;  %v274_v45 = vor.u32 4788187, %v273_v42  ;;  %v277_v20 = vcvt.s32.f32 %v270_v6  ;;  %v1744_v22 = vadd.s32 4294967294, %v469_v30 }
 0x10c   :  { %2063 = vcosq.f32 %v180_v44  ;;  %vm607_vm3 = vcmp.eq.s32.totalorder %v602_v61, 2  ;;  %v385_v41 = vsel %vm300_vm14, %v384_v37, %v2408_v34  ;;  %vm287_vm4 = vweird.f32 %v2285_v39 }
 0x10d   :  { %2065 = vsinq.f32 %v180_v44  ;;  %v275_v0 = vand.u32 2147483647, %v274_v45  ;;  %vm1745_vm1 = vcmp.lt.s32.totalorder %v1744_v22, 0  ;;  %vm403_vm5 = vcmp.lt.s32.totalorder %v2283_v38, 0 }
 0x10e   :  { %v472_v26 = vsel %vm1745_vm1, 0, %v1744_v22  ;;  %v487_v2 = vsub.s32 4, %v2559_v12  ;;  %vm2626_vm6 = vcmp.le.f32.partialorder %v401_v14, 0.7853982  ;;  %vm603_vm7 = vcmp.lt.s32.totalorder %v602_v61, 2 }
 0x10f   :  { %v278_v36 = vmul.f32 %v277_v20, %v275_v0  ;;  %v473_v32 = vsub.s32 32, %v472_v26  ;;  %v477_v54 = vsub.s32 4294967266, %v472_v26  ;;  %v474_v50 = vshll.u32 %v465_v24, %v472_v26  ;;  %v2027_v26 = vld [vmem:[#allocation2 + $0x48] sm:$0xff]  }
 0x110   :  { %v2632_v9 = vsel %vm2590_vm15, 0, %v385_v41  ;;  %vm289_vm8 = vcmp.lt.s32.totalorder %v288_v60, 2  ;;  %vm290_vm9 = vcmp.eq.s32.totalorder %v288_v60, 0  ;;  %vm184_vm10 = vweird.f32 %v2292_v52 }
 0x111   :  { %v279_v27 = vxor.u32 2147483648, %v278_v36  ;;  %v475_v57 = vshrl.u32 %v457_v55, %v473_v32  ;;  %v478_v58 = vadd.s32 127, %v477_v54  ;;  %vm293_vm11 = vcmp.eq.s32.totalorder %v288_v60, 2  ;;  %v2031_v54 = vld [vmem:[#allocation2 + $0x50] sm:$0xff]  }
 0x112   :  { %vm708_vm12 = vcmp.eq.s32.totalorder %v706_v63, 0  ;;  %v488_v33 = vsel %vm403_vm5, %v487_v2, %v2559_v12  ;;  %v809_v11 = vadd.s32 3, %v2632_v9  ;;  %vm707_vm14 = vcmp.lt.s32.totalorder %v706_v63, 2  ;;  %v2039_v2 = vld [vmem:[#allocation2 + $0x60] sm:$0xff]  }
 0x113   :  { %v280_v43 = vsel %vm197_vm13, %v279_v27, %v278_v36  ;;  %v476_v8 = vor.u32 %v475_v57, %v474_v50  ;;  %v479_v35 = vshll.u32 %v478_v58, 23  ;;  %vm711_vm13 = vcmp.eq.s32.totalorder %v706_v63, 2 }
 0x114   :  { %v283_v53 = vsel %vm196_vm0, %v2285_v39, %v280_v43  ;;  %v490_v30 = vsel %vm2626_vm6, 0, %v488_v33  ;;  %v810_v4 = vand.u32 3, %v809_v11  ;;  %v2029_v39 = vld [vmem:[#allocation2 + $0x8] sm:$0xff]   ;;  %v185_v11 = vand.u32 3, %v2585_v15 }
 0x115   :  { %2067 = vcosq.f32 %v283_v53  ;;  %v480_v62 = vor.u32 4788187, %v479_v35  ;;  %v483_v1 = vcvt.s32.f32 %v476_v8  ;;  %v2035_v8 = vld [vmem:[#allocation2 + $0x58] sm:$0xff]   ;;  %v2043_v33 = vld [vmem:[#allocation2 + $0x68] sm:$0xff]  }
 0x116   :  { %v2605_v48 = vpop.eup %2063  ;;  %2069 = vsinq.f32 %v283_v53  ;;  %v913_v53 = vadd.s32 3, %v490_v30  ;;  %vm812_vm15 = vcmp.eq.s32.totalorder %v810_v4, 0  ;;  %vm815_vm0 = vcmp.eq.s32.totalorder %v810_v4, 2 }
 0x117   :  { %v2607_v13 = vpop.eup %2065  ;;  %v191_v5 = vxor.u32 2147483648, %v2605_v48  ;;  %2071 = vcosq.f32 %v386_v17  ;;  %v481_v18 = vand.u32 2147483647, %v480_v62  ;;  %vm811_vm1 = vcmp.lt.s32.totalorder %v810_v4, 2  ;;  %v2048_v4 = vld [vmem:[#allocation2 + $0xf0] sm:$0xff]  }
 0x118   :  { %v188_v28 = vxor.u32 2147483648, %v2607_v13  ;;  %2073 = vsinq.f32 %v386_v17  ;;  %v494_v17 = vand.u32 3, %v490_v30  ;;  %v914_v50 = vand.u32 3, %v913_v53  ;;  %v2038_v30 = vld [vmem:[#allocation2 + $0x98] sm:$0xff]  }
 0x119   :  { %v609_v19 = vsel %vm607_vm3, %v191_v5, %v2607_v13  ;;  %v484_v7 = vmul.f32 %v483_v1, %v481_v18  ;;  %v2037_v1 = vld [vmem:[#allocation2 + $0x18] sm:$0xff]  }
 0x11a   :  { %v606_v56 = vsel %vm604_vm2, %v2605_v48, %v188_v28  ;;  %vm390_vm2 = vweird.f32 %v2290_v51  ;;  %vm496_vm3 = vcmp.eq.s32.totalorder %v494_v17, 0  ;;  %v2054_v53 = vld [vmem:[#allocation2 + $0xb8] sm:$0xff]   ;;  %v2059_v51 = vld [vmem:[#allocation7 + $0x20] sm:$0xff]  }
 0x11b   :  { %v610_v24 = vsel %vm603_vm7, %v606_v56, %v609_v19  ;;  %v485_v14 = vxor.u32 2147483648, %v484_v7  ;;  %vm495_vm7 = vcmp.lt.s32.totalorder %v494_v17, 2 }
 0x11c   :  { %v611_v45 = vsel %vm184_vm10, nan, %v610_v24 }
 0x11d   :  { %v486_v44 = vsel %vm403_vm5, %v485_v14, %v484_v7  ;;  %v924_v22 = vpack.c.bf16 %v611_v45, %v611_v45  ;;  %vm919_vm5 = vcmp.eq.s32.totalorder %v914_v50, 2  ;;  %v2041_v14 = vld [vmem:[#allocation2 + $0x20] sm:$0xff]   ;;  %v2034_v45 = vld [vmem:[#allocation2 + $0x90] sm:$0xff]  }
 0x11e   :  { %v489_v12 = vsel %vm2626_vm6, %v2283_v38, %v486_v44  ;;  %vm916_vm6 = vcmp.eq.s32.totalorder %v914_v50, 0  ;;  %v2047_v44 = vld [vmem:[#allocation2 + $0x70] sm:$0xff]  }
 0x11f   :  { %v2068_v16 = vpop.eup %2067  ;;  %2075 = vcosq.f32 %v489_v12 }
 0x120   :  { %v2070_v6 = vpop.eup %2069  ;;  %v294_v42 = vxor.u32 2147483648, %v2068_v16  ;;  %2077 = vsinq.f32 %v489_v12  ;;  %v2049_v12 = vld [vmem:[#allocation2 + $0x30] sm:$0xff]  }
 0x121   :  { %v291_v10 = vxor.u32 2147483648, %v2070_v6  ;;  %v2643_v46 = vpop.eup %2071 }
 0x122   :  { %v295_v21 = vsel %vm293_vm11, %v294_v42, %v2070_v6  ;;  %v713_v31 = vsel %vm711_vm13, %v294_v42, %v2070_v6  ;;  %v2649_v20 = vpop.eup %2073  ;;  %v397_v40 = vxor.u32 2147483648, %v2643_v46  ;;  %v2026_v6 = vld [vmem:[#allocation2 + $0x80] sm:$0xff]   ;;  %v2028_v42 = vld [vmem:[#allocation2 + $0xc8] sm:$0xff]   ;;  %vm187_vm11 = vcmp.eq.s32.totalorder %v185_v11, 0 }
 0x123   :  { %v292_v23 = vsel %vm290_vm9, %v2068_v16, %v291_v10  ;;  %v710_v0 = vsel %vm708_vm12, %v2068_v16, %v291_v10  ;;  %v394_v43 = vxor.u32 2147483648, %v2649_v20  ;;  %vm493_vm9 = vweird.f32 %v2283_v38  ;;  %v2030_v38 = vld [vmem:[#allocation2 + $0x88] sm:$0xff]  }
 0x124   :  { %v296_v3 = vsel %vm289_vm8, %v292_v23, %v295_v21  ;;  %v714_v25 = vsel %vm707_vm14, %v710_v0, %v713_v31  ;;  %v817_v32 = vsel %vm815_vm0, %v397_v40, %v2649_v20  ;;  %vm915_vm8 = vcmp.lt.s32.totalorder %v914_v50, 2  ;;  %v2032_v21 = vld [vmem:[#allocation2 + $0xd0] sm:$0xff]   ;;  %v2045_v31 = vld [vmem:[#allocation2 + $0x28] sm:$0xff]   ;;  %v2036_v0 = vld [vmem:[#allocation2 + $0xd8] sm:$0xff]  }
 0x125   :  { %v297_v36 = vsel %vm287_vm4, nan, %v296_v3  ;;  %v715_v47 = vsel %vm287_vm4, nan, %v714_v25  ;;  %v814_v55 = vsel %vm812_vm15, %v2643_v46, %v394_v43  ;;  %vm499_vm4 = vcmp.eq.s32.totalorder %v494_v17, 2  ;;  %v2051_v3 = vld [vmem:[#allocation2 + $0x78] sm:$0xff]   ;;  %v2061_v17 = vld [vmem:[#allocation7 + $0x30] sm:$0xff]  }
 0x126   :  { %v925_v27 = vpack.c.bf16 %v715_v47, %v715_v47  ;;  %v505_v49 = vpack.c.bf16 %v297_v36, %v297_v36  ;;  %v818_v58 = vsel %vm811_vm1, %v814_v55, %v817_v32  ;;  %vm190_vm12 = vcmp.eq.s32.totalorder %v185_v11, 2  ;;  %v2040_v36 = vld [vmem:[#allocation2 + $0xe0] sm:$0xff]   ;;  %v2053_v47 = vld [vmem:[#allocation2 + $0x38] sm:$0xff]  }
 0x127   :  { %v819_v63 = vsel %vm390_vm2, nan, %v818_v58  ;;  %v189_v23 = vsel %vm187_vm11, %v2605_v48, %v188_v28  ;;  %v192_v15 = vsel %vm190_vm12, %v191_v5, %v2607_v13  ;;  %vm186_vm13 = vcmp.lt.s32.totalorder %v185_v11, 2  ;;  %v2042_v48 = vld [vmem:[#allocation2 + $0xa0] sm:$0xff]   ;;  %v2044_v13 = vld [vmem:[#allocation2 + $0xe8] sm:$0xff]   ;;  %v2062_v50 = vld [vmem:[#allocation7 + $0x38] sm:$0xff]  }
 0x128   :  { %1280 = vmatprep.mubr.bf16.mxu0 %v925_v27  ;;  %v926_v16 = vpack.c.bf16 %v819_v63, %v819_v63  ;;  %v193_v25 = vsel %vm186_vm13, %v189_v23, %v192_v15  ;;  %v2046_v27 = vld [vmem:[#allocation2 + $0xa8] sm:$0xff]   ;;  %v2192_v32 = vmov 0.0   ;;  %vm2193_vm0 = vmmov 0  }
 0x129   :  { %1281 = vmatmul.mubr.bf16.vlgmr.msra.gmra.mrb[0].mxu0 %v924_v22  ;;  %v2076_v57 = vpop.eup %2075  ;;  %v194_v28 = vsel %vm184_vm10, nan, %v193_v25  ;;  %v391_v22 = vand.u32 3, %v2632_v9 }
 0x12a   :  { %1880 = vmatpush3.bf16.msra.mxu0 %v2025_v29  ;;  %1552 = vmatprep.mubr.bf16.mxu0 %v505_v49  ;;  %v2078_v61 = vpop.eup %2077  ;;  %v500_v37 = vxor.u32 2147483648, %v2076_v57  ;;  %v504_v5 = vpack.c.bf16 %v194_v28, %v194_v28  ;;  %v2052_v49 = vld [vmem:[#allocation2 + $0xf8] sm:$0xff]  }
 0x12b   :  { %1881 = vmatprep.subr.bf16.mxu0 %v2027_v26  ;;  %v497_v35 = vxor.u32 2147483648, %v2078_v61  ;;  %vm393_vm14 = vcmp.eq.s32.totalorder %v391_v22, 0  ;;  %vm396_vm15 = vcmp.eq.s32.totalorder %v391_v22, 2  ;;  %v2050_v26 = vld [vmem:[#allocation2 + $0xb0] sm:$0xff]   ;;  %vm392_vm10 = vcmp.lt.s32.totalorder %v391_v22, 2 }
 0x12c   :  { %v501_v60 = vsel %vm499_vm4, %v500_v37, %v2078_v61  ;;  %v921_v62 = vsel %vm919_vm5, %v500_v37, %v2078_v61  ;;  %v395_v52 = vsel %vm393_vm14, %v2643_v46, %v394_v43  ;;  %v398_v29 = vsel %vm396_vm15, %v397_v40, %v2649_v20  ;;  %v2055_v43 = vld [vmem:[#allocation7] sm:$0xff]   ;;  %v2056_v46 = vld [vmem:[#allocation7 + $0x8] sm:$0xff]   ;;  %v2057_v20 = vld [vmem:[#allocation7 + $0x10] sm:$0xff]  }
 0x12d   :  { %v498_v41 = vsel %vm496_vm3, %v2076_v57, %v497_v35  ;;  %v918_v18 = vsel %vm916_vm6, %v2076_v57, %v497_v35  ;;  %v399_v9 = vsel %vm392_vm10, %v395_v52, %v398_v29  ;;  %v2058_v40 = vld [vmem:[#allocation7 + $0x18] sm:$0xff]  }
 0x12e   :  { %1882 = vmatpush3.bf16.msra.mxu0 %v2029_v39  ;;  %v502_v56 = vsel %vm495_vm7, %v498_v41, %v501_v60  ;;  %v922_v19 = vsel %vm915_vm8, %v918_v18, %v921_v62  ;;  %v400_v39 = vsel %vm390_vm2, nan, %v399_v9 }
 0x12f   :  { %1883 = vmatprep.subr.bf16.mxu0 %v2031_v54  ;;  %v503_v34 = vsel %vm493_vm9, nan, %v502_v56  ;;  %v923_v7 = vsel %vm493_vm9, nan, %v922_v19  ;;  %v506_v55 = vpack.c.bf16 %v400_v39, %v400_v39  ;;  %v2060_v54 = vld [vmem:[#allocation7 + $0x28] sm:$0xff]  }
 0x130   :  { %v927_v24 = vpack.c.bf16 %v923_v7, %v923_v7  ;;  %v507_v10 = vpack.c.bf16 %v503_v34, %v503_v34 }
 0x132   :  { %1884 = vmatpush3.bf16.msra.mxu0 %v2033_v59  ;;  %1320 = vmatprep.mubr.bf16.mxu1 %v927_v24 }
 0x133   :  { %1885 = vmatprep.subr.bf16.mxu0 %v2035_v8  ;;  %1321 = vmatmul.mubr.bf16.vlgmr.msra.gmra.mrb[0].mxu1 %v926_v16 }
 0x134   :  { %1902 = vmatpush3.bf16.msra.mxu1 %v2026_v6  ;;  %1592 = vmatprep.mubr.bf16.mxu1 %v507_v10 }
 0x135   :  { %1903 = vmatprep.subr.bf16.mxu1 %v2028_v42 }
 0x136   :  { %1886 = vmatpush3.bf16.msra.mxu0 %v2037_v1 }
 0x137   :  { %1887 = vmatprep.subr.bf16.mxu0 %v2039_v2 }
 0x138   :  { %1904 = vmatpush3.bf16.msra.mxu1 %v2030_v38 }
 0x139   :  { %1905 = vmatprep.subr.bf16.mxu1 %v2032_v21 }
 0x13a   :  { %1888 = vmatpush3.bf16.msra.mxu0 %v2041_v14 }
 0x13b   :  { %1889 = vmatprep.subr.bf16.mxu0 %v2043_v33 }
 0x13c   :  { %1906 = vmatpush3.bf16.msra.mxu1 %v2034_v45 }
 0x13d   :  { %1907 = vmatprep.subr.bf16.mxu1 %v2036_v0 }
 0x13e   :  { %1890 = vmatpush3.bf16.msra.mxu0 %v2045_v31 }
 0x13f   :  { %1891 = vmatprep.subr.bf16.mxu0 %v2047_v44 }
 0x140   :  { %1908 = vmatpush3.bf16.msra.mxu1 %v2038_v30 }
 0x141   :  { %1909 = vmatprep.subr.bf16.mxu1 %v2040_v36 }
 0x142   :  { %1892 = vmatpush3.bf16.msra.mxu0 %v2049_v12 }
 0x143   :  { %1893 = vmatprep.subr.bf16.mxu0 %v2051_v3 }
 0x144   :  { %1910 = vmatpush3.bf16.msra.mxu1 %v2042_v48 }
 0x145   :  { %1911 = vmatprep.subr.bf16.mxu1 %v2044_v13 }
 0x146   :  { %1894 = vmatpush3.bf16.msra.mxu0 %v2053_v47 }
 0x147   :  { %1932 = vmatprep.subr.bf16.mxu0 %v2192_v32 }
 0x148   :  { %1912 = vmatpush3.bf16.msra.mxu1 %v2046_v27 }
 0x149   :  { %1553 = vmatmul.mubr.bf16.vlgmr.msra.gmra.mrb[4].mxu0 %v504_v5  ;;  %1913 = vmatprep.subr.bf16.mxu1 %v2048_v4 }
 0x14a   :  { %1933 = vmatpush3.bf16.msra.mxu0 %v2055_v43  ;;  %1948 = vmatprep.mubr.msk.bf16.mxu0 %vm2193_vm0, %v2192_v32 }
 0x14b   :  { %1934 = vmatprep.subr.bf16.mxu0 %v2192_v32 }
 0x14c   :  { %1914 = vmatpush3.bf16.msra.mxu1 %v2050_v26 }
 0x14d   :  { %1915 = vmatprep.subr.bf16.mxu1 %v2052_v49 }
 0x14e   :  { %1935 = vmatpush3.bf16.msra.mxu0 %v2056_v46 }
 0x14f   :  { %1936 = vmatprep.subr.bf16.mxu0 %v2192_v32 }
 0x150   :  { %1916 = vmatpush3.bf16.msra.mxu1 %v2054_v53 }
 0x152   :  { %1937 = vmatpush3.bf16.msra.mxu0 %v2057_v20 }
 0x153   :  { %1593 = vmatmul.mubr.bf16.vlgmr.msra.gmra.mrb[4].mxu1 %v506_v55  ;;  %1938 = vmatprep.subr.bf16.mxu0 %v2192_v32 }
 0x156   :  { %1939 = vmatpush3.bf16.msra.mxu0 %v2058_v40 }
 0x157   :  { %1940 = vmatprep.subr.bf16.mxu0 %v2192_v32 }
 0x15a   :  { %1941 = vmatpush3.bf16.msra.mxu0 %v2059_v51 }
 0x15b   :  { %1942 = vmatprep.subr.bf16.mxu0 %v2192_v32 }
 0x15e   :  { %1943 = vmatpush3.bf16.msra.mxu0 %v2060_v54 }
 0x15f   :  { %1944 = vmatprep.subr.bf16.mxu0 %v2192_v32 }
 0x162   :  { %1945 = vmatpush3.bf16.msra.mxu0 %v2061_v17 }
 0x163   :  { %1946 = vmatprep.subr.bf16.mxu0 %v2192_v32 }
 0x166   :  { %1947 = vmatpush3.bf16.msra.mxu0 %v2062_v50 }
 0x1fc   :  { %v1851_v57 = vpop.f32.mrb[0].mxu0 }
 0x1fd   :  { %v1852_v58 = vpop.f32.mrb[1].mxu0 }
 0x1fe   :  { %v1853_v59 = vadd.f32 %v1852_v58, %v1851_v57  ;;  %v1854_v61 = vpop.f32.mrb[2].mxu0 }
 0x1ff   :  { %v1855_v37 = vpop.f32.mrb[3].mxu0 }
 0x206   :  { %v1873_v8 = vpop.f32.mrb[0].mxu1 }
 0x207   :  { %v1874_v35 = vpop.f32.mrb[1].mxu1 }
 0x208   :  { %v1875_v60 = vadd.f32 %v1874_v35, %v1873_v8  ;;  %v1876_v62 = vpop.f32.mrb[2].mxu1 }
 0x209   :  { %v1877_v63 = vpop.f32.mrb[3].mxu1 }
 0x20a   :  { %v1323_v41 = vadd.f32 %v1875_v60, %v1853_v59 }
 0x21c   :  { %v1895_v18 = vpop.f32.mrb[4].mxu0 }
 0x21d   :  { %v1896_v1 = vpop.f32.mrb[5].mxu0 }
 0x21e   :  { %v1897_v56 = vadd.f32 %v1896_v1, %v1895_v18  ;;  %v1898_v19 = vpop.f32.mrb[6].mxu0 }
 0x21f   :  { %v1899_v2 = vpop.f32.mrb[7].mxu0 }
 0x220   :  { %v1555_v34 = vadd.f32 %v1897_v56, %v1323_v41 }
 0x226   :  { %v1917_v7 = vpop.f32.mrb[4].mxu1 }
 0x227   :  { %v1918_v16 = vpop.f32.mrb[5].mxu1 }
 0x228   :  { %v1919_v24 = vadd.f32 %v1918_v16, %v1917_v7  ;;  %v1920_v6 = vpop.f32.mrb[6].mxu1 }
 0x229   :  { %v1921_v42 = vpop.f32.mrb[7].mxu1 }
 0x22a   :  { %v1595_v14 = vadd.f32 %v1919_v24, %v1555_v34 }
 0x22c   :  { %v1826_v10 = vmul.f32 -1.442695, %v1595_v14 }
 0x22e   :  { %2079 = vpow2.f32 %v1826_v10 }
 0x238   :  { %v2080_v33 = vpop.eup %2079 }
 0x239   :  { %v1603_v11 = vadd.f32 1.0, %v2080_v33 }
 0x23b   :  { %2081 = vrcp.f32 %v1603_v11 }
 0x245   :  { %v2082_v38 = vpop.eup %2081 }
 0x246   :  { %v1606_v21 = vmul.f32 %v2082_v38, %v1595_v14 }
 0x248   :  { %v1607_v31 = vpack.c.bf16 %v1606_v21, %v1606_v21 }
 0x24a   :  { %1949 = vmatmul.mubr.bf16.vlgmr.msra.gmra.mrb[8].mxu0 %v1607_v31 }
 0x31d   :  { %v1706_v44 = vpop.f32.mrb[8].mxu0 }
 0x31e   :  { %1712 = vst [vmem:[#allocation8] sm:$0xff] %v1706_v44  ;;  %v1950_v45 = vpop.f32.mrb[9].mxu0 }
 0x31f   :  { %v1709_v23 = vpop.f32.mrb[10].mxu0 }
 0x320   :  { %2160 = shalt.err (!%p2157_p0)
}
 0x321   :  { %s2161_s10 = scalar_lea.hbm %s2705_s5, 128 }
 0x322   :  { %p2162_p1 = scmp.ne.s32.totalorder %s2705_s5, %s2161_s10  ;;  %p2165_p2 = scmp.lt.u32.totalorder %s2161_s10, %s2705_s5 }
 0x324   :  { %p2167_p3 = pnand %p2165_p2, %p2162_p1 }
 0x326   :  { %2170 = shalt.err (!%p2167_p3)
}
 0x327   :  { %1722 = dma.vmem_to_hbm [thread:$0]  %s1720_s30, 128, %s2705_s5, [#allocation4]   ;;  %v1951_v15 = vpop.f32.mrb[11].mxu0 }
 0x328   :  { %2175 = dma.done.wait [#allocation4], 128  }
 0x329   :  { %2176 = vsyncadd [#allocation4], 4294967168 }
 0x32a   :  { %1726 = vsyncpa [#allocation3], 1 }
 0x32b   :  { %1727 = vsyncpa [#allocation6], 1 }
 0x32c   :  { %1728 = vsyncpa [#allocation4], 1 }

</bundles_post_ra>
